<compile_context>
chip_gen: v6e
topology: v6e:2x2x1
jax: 0.10.0
libtpu: 0.0.40
codegen_flags: <defaults>
</compile_context>

<pallas_src>
import jax
import jax.numpy as jnp
from jax.experimental import pallas as pl
from jax.experimental.pallas import tpu as pltpu


def _round_up(x, m):
    return ((x + m - 1) // m) * m


def _embed_gather_kernel(ids_ref, table_hbm, out_ref, copy_sems):
    # ids_ref:   (T_pad,) int32 in SMEM (scalar prefetch)
    # table_hbm: (V, D)   float32, raw HBM ref (memory_space=pl.ANY)
    # out_ref:   (TT, D)  float32 output tile in VMEM
    # copy_sems: (TT,)    DMA semaphores
    i = pl.program_id(0)
    tt, _ = out_ref.shape
    v = table_hbm.shape[0]

    # Issue all row fetches (HBM table row -> output VMEM tile row), then wait.
    # tt is a compile-time constant, so this Python loop fully unrolls and all
    # DMAs are in flight concurrently.
    for t in range(tt):
        row = ids_ref[i * tt + t]
        row = jnp.minimum(jnp.maximum(row, 0), v - 1)  # keep DMA in bounds
        pltpu.make_async_copy(
            table_hbm.at[pl.ds(row, 1), :],
            out_ref.at[pl.ds(t, 1), :],
            copy_sems.at[t],
        ).start()

    for t in range(tt):
        pltpu.make_async_copy(
            table_hbm.at[pl.ds(0, 1), :],      # same-shaped descriptor for wait
            out_ref.at[pl.ds(t, 1), :],
            copy_sems.at[t],
        ).wait()


def embedding_forward(x, table, *, tile_tokens=32):
    """x: (B, S) int token ids; table: (V, D) float32. Returns (B, S, D)."""
    B, S = x.shape
    V, D = table.shape
    T = B * S

    # Sublane-friendly token tile; pad the flat token stream to a multiple of it.
    tt = max(8, min(int(tile_tokens), _round_up(T, 8)))
    tt = _round_up(tt, 8)
    T_pad = _round_up(T, tt)

    ids_flat = x.reshape(-1).astype(jnp.int32)
    if T_pad != T:
        # Padded slots gather row 0; they are stripped below.
        ids_flat = jnp.pad(ids_flat, (0, T_pad - T))

    itemsize = jnp.dtype(table.dtype).itemsize
    out_flat = pl.pallas_call(
        _embed_gather_kernel,
        out_shape=jax.ShapeDtypeStruct((T_pad, D), table.dtype),
        grid_spec=pltpu.PrefetchScalarGridSpec(
            num_scalar_prefetch=1,                       # ids -> SMEM
            grid=(T_pad // tt,),
            in_specs=[pl.BlockSpec(memory_space=pl.ANY)],  # table stays in HBM
            out_specs=pl.BlockSpec((tt, D), lambda i, ids: (i, 0)),
            scratch_shapes=[pltpu.SemaphoreType.DMA((tt,))],
        ),
        compiler_params=pltpu.CompilerParams(
            dimension_semantics=("parallel",),           # shard over TCs (v7x)
        ),
        cost_estimate=pl.CostEstimate(
            flops=0,
            transcendentals=0,
            bytes_accessed=2 * T_pad * D * itemsize + T_pad * 4,
        ),
    )(ids_flat, table)

    return out_flat[:T].reshape(B, S, D)


if __name__ == "__main__":
    # Module config: num_unique_tokens=64, embed_dim=32
    V, D = 64, 32
    B, S = 2, 8

    key = jax.random.PRNGKey(0)
    k_tab, k_ids = jax.random.split(key)

    # nn.Embedding default init: weight ~ N(0, 1)
    table = jax.random.normal(k_tab, (V, D), dtype=jnp.float32)
    x = jax.random.randint(k_ids, (B, S), 0, V, dtype=jnp.int32)

    # tile_tokens=8 -> 2 grid steps for this toy size (keeps both v7x TCs busy).
    out = embedding_forward(x, table, tile_tokens=8)
    out = jax.block_until_ready(out)

    # Reference check against a plain JAX gather (same semantics as torch).
    ref = jnp.take(table, x, axis=0)
    assert out.shape == (B, S, D)
    assert jnp.allclose(out, ref, atol=1e-6), "mismatch vs reference gather"

    print("KERNEL_OK")
</pallas_src>

<mosaic_0001>
module attributes {stable_mosaic.version = 11 : i64} {
  func.func @_embed_gather_kernel(%arg0: i32, %arg1: memref<16xi32, #tpu.memory_space<smem>>, %arg2: memref<64x32xf32, #tpu.memory_space<any>>, %arg3: memref<8x32xf32, #tpu.memory_space<vmem>>, %arg4: memref<8x!tpu.dma_semaphore, #tpu.memory_space<semaphore_mem>>) attributes {dimension_semantics = [#tpu.dimension_semantics<parallel>], iteration_bounds = array<i64: 2>, scalar_prefetch = 1 : i64, scratch_operands = 1 : i64, tpu.core_type = #tpu.core_type<tc>, window_params = [{}, {transform_indices = @transform_1, window_bounds = array<i64: 8, 32>}]} {
    %c8_i32 = arith.constant 8 : i32
    %0 = arith.muli %arg0, %c8_i32 : i32
    %c0_i32 = arith.constant 0 : i32
    %1 = arith.addi %0, %c0_i32 : i32
    %2 = arith.index_cast %1 : i32 to index
    %3 = memref.load %arg1[%2] : memref<16xi32, #tpu.memory_space<smem>>
    %c0_i32_0 = arith.constant 0 : i32
    %4 = arith.maxsi %3, %c0_i32_0 : i32
    %c63_i32 = arith.constant 63 : i32
    %5 = arith.minsi %4, %c63_i32 : i32
    %c0_i32_1 = arith.constant 0 : i32
    %c0_i32_2 = arith.constant 0 : i32
    %6 = tpu.memref_slice %arg2[%5, %c0_i32_2] : memref<64x32xf32, #tpu.memory_space<any>> -> memref<1x32xf32, #tpu.memory_space<any>>
    %c0_i32_3 = arith.constant 0 : i32
    %c0_i32_4 = arith.constant 0 : i32
    %7 = tpu.memref_slice %arg3[%c0_i32_3, %c0_i32_4] : memref<8x32xf32, #tpu.memory_space<vmem>> -> memref<1x32xf32, #tpu.memory_space<vmem>>
    %8 = tpu.memref_slice %arg4[%c0_i32_1] : memref<8x!tpu.dma_semaphore, #tpu.memory_space<semaphore_mem>> -> memref<1x!tpu.dma_semaphore, #tpu.memory_space<semaphore_mem>>
    %9 = tpu.memref_squeeze %8 : memref<1x!tpu.dma_semaphore, #tpu.memory_space<semaphore_mem>> -> memref<!tpu.dma_semaphore, #tpu.memory_space<semaphore_mem>>
    tpu.enqueue_dma source(%6 : memref<1x32xf32, #tpu.memory_space<any>>) target(%7 : memref<1x32xf32, #tpu.memory_space<vmem>>) target_semaphore(%9 : memref<!tpu.dma_semaphore, #tpu.memory_space<semaphore_mem>>)
    %c8_i32_5 = arith.constant 8 : i32
    %10 = arith.muli %arg0, %c8_i32_5 : i32
    %c1_i32 = arith.constant 1 : i32
    %11 = arith.addi %10, %c1_i32 : i32
    %12 = arith.index_cast %11 : i32 to index
    %13 = memref.load %arg1[%12] : memref<16xi32, #tpu.memory_space<smem>>
    %c0_i32_6 = arith.constant 0 : i32
    %14 = arith.maxsi %13, %c0_i32_6 : i32
    %c63_i32_7 = arith.constant 63 : i32
    %15 = arith.minsi %14, %c63_i32_7 : i32
    %c1_i32_8 = arith.constant 1 : i32
    %c0_i32_9 = arith.constant 0 : i32
    %16 = tpu.memref_slice %arg2[%15, %c0_i32_9] : memref<64x32xf32, #tpu.memory_space<any>> -> memref<1x32xf32, #tpu.memory_space<any>>
    %c1_i32_10 = arith.constant 1 : i32
    %c0_i32_11 = arith.constant 0 : i32
    %17 = tpu.memref_slice %arg3[%c1_i32_10, %c0_i32_11] : memref<8x32xf32, #tpu.memory_space<vmem>> -> memref<1x32xf32, #tpu.memory_space<vmem>>
    %18 = tpu.memref_slice %arg4[%c1_i32_8] : memref<8x!tpu.dma_semaphore, #tpu.memory_space<semaphore_mem>> -> memref<1x!tpu.dma_semaphore, #tpu.memory_space<semaphore_mem>>
    %19 = tpu.memref_squeeze %18 : memref<1x!tpu.dma_semaphore, #tpu.memory_space<semaphore_mem>> -> memref<!tpu.dma_semaphore, #tpu.memory_space<semaphore_mem>>
    tpu.enqueue_dma source(%16 : memref<1x32xf32, #tpu.memory_space<any>>) target(%17 : memref<1x32xf32, #tpu.memory_space<vmem>>) target_semaphore(%19 : memref<!tpu.dma_semaphore, #tpu.memory_space<semaphore_mem>>)
    %c8_i32_12 = arith.constant 8 : i32
    %20 = arith.muli %arg0, %c8_i32_12 : i32
    %c2_i32 = arith.constant 2 : i32
    %21 = arith.addi %20, %c2_i32 : i32
    %22 = arith.index_cast %21 : i32 to index
    %23 = memref.load %arg1[%22] : memref<16xi32, #tpu.memory_space<smem>>
    %c0_i32_13 = arith.constant 0 : i32
    %24 = arith.maxsi %23, %c0_i32_13 : i32
    %c63_i32_14 = arith.constant 63 : i32
    %25 = arith.minsi %24, %c63_i32_14 : i32
    %c2_i32_15 = arith.constant 2 : i32
    %c0_i32_16 = arith.constant 0 : i32
    %26 = tpu.memref_slice %arg2[%25, %c0_i32_16] : memref<64x32xf32, #tpu.memory_space<any>> -> memref<1x32xf32, #tpu.memory_space<any>>
    %c2_i32_17 = arith.constant 2 : i32
    %c0_i32_18 = arith.constant 0 : i32
    %27 = tpu.memref_slice %arg3[%c2_i32_17, %c0_i32_18] : memref<8x32xf32, #tpu.memory_space<vmem>> -> memref<1x32xf32, #tpu.memory_space<vmem>>
    %28 = tpu.memref_slice %arg4[%c2_i32_15] : memref<8x!tpu.dma_semaphore, #tpu.memory_space<semaphore_mem>> -> memref<1x!tpu.dma_semaphore, #tpu.memory_space<semaphore_mem>>
    %29 = tpu.memref_squeeze %28 : memref<1x!tpu.dma_semaphore, #tpu.memory_space<semaphore_mem>> -> memref<!tpu.dma_semaphore, #tpu.memory_space<semaphore_mem>>
    tpu.enqueue_dma source(%26 : memref<1x32xf32, #tpu.memory_space<any>>) target(%27 : memref<1x32xf32, #tpu.memory_space<vmem>>) target_semaphore(%29 : memref<!tpu.dma_semaphore, #tpu.memory_space<semaphore_mem>>)
    %c8_i32_19 = arith.constant 8 : i32
    %30 = arith.muli %arg0, %c8_i32_19 : i32
    %c3_i32 = arith.constant 3 : i32
    %31 = arith.addi %30, %c3_i32 : i32
    %32 = arith.index_cast %31 : i32 to index
    %33 = memref.load %arg1[%32] : memref<16xi32, #tpu.memory_space<smem>>
    %c0_i32_20 = arith.constant 0 : i32
    %34 = arith.maxsi %33, %c0_i32_20 : i32
    %c63_i32_21 = arith.constant 63 : i32
    %35 = arith.minsi %34, %c63_i32_21 : i32
    %c3_i32_22 = arith.constant 3 : i32
    %c0_i32_23 = arith.constant 0 : i32
    %36 = tpu.memref_slice %arg2[%35, %c0_i32_23] : memref<64x32xf32, #tpu.memory_space<any>> -> memref<1x32xf32, #tpu.memory_space<any>>
    %c3_i32_24 = arith.constant 3 : i32
    %c0_i32_25 = arith.constant 0 : i32
    %37 = tpu.memref_slice %arg3[%c3_i32_24, %c0_i32_25] : memref<8x32xf32, #tpu.memory_space<vmem>> -> memref<1x32xf32, #tpu.memory_space<vmem>>
    %38 = tpu.memref_slice %arg4[%c3_i32_22] : memref<8x!tpu.dma_semaphore, #tpu.memory_space<semaphore_mem>> -> memref<1x!tpu.dma_semaphore, #tpu.memory_space<semaphore_mem>>
    %39 = tpu.memref_squeeze %38 : memref<1x!tpu.dma_semaphore, #tpu.memory_space<semaphore_mem>> -> memref<!tpu.dma_semaphore, #tpu.memory_space<semaphore_mem>>
    tpu.enqueue_dma source(%36 : memref<1x32xf32, #tpu.memory_space<any>>) target(%37 : memref<1x32xf32, #tpu.memory_space<vmem>>) target_semaphore(%39 : memref<!tpu.dma_semaphore, #tpu.memory_space<semaphore_mem>>)
    %c8_i32_26 = arith.constant 8 : i32
    %40 = arith.muli %arg0, %c8_i32_26 : i32
    %c4_i32 = arith.constant 4 : i32
    %41 = arith.addi %40, %c4_i32 : i32
    %42 = arith.index_cast %41 : i32 to index
    %43 = memref.load %arg1[%42] : memref<16xi32, #tpu.memory_space<smem>>
    %c0_i32_27 = arith.constant 0 : i32
    %44 = arith.maxsi %43, %c0_i32_27 : i32
    %c63_i32_28 = arith.constant 63 : i32
    %45 = arith.minsi %44, %c63_i32_28 : i32
    %c4_i32_29 = arith.constant 4 : i32
    %c0_i32_30 = arith.constant 0 : i32
    %46 = tpu.memref_slice %arg2[%45, %c0_i32_30] : memref<64x32xf32, #tpu.memory_space<any>> -> memref<1x32xf32, #tpu.memory_space<any>>
    %c4_i32_31 = arith.constant 4 : i32
    %c0_i32_32 = arith.constant 0 : i32
    %47 = tpu.memref_slice %arg3[%c4_i32_31, %c0_i32_32] : memref<8x32xf32, #tpu.memory_space<vmem>> -> memref<1x32xf32, #tpu.memory_space<vmem>>
    %48 = tpu.memref_slice %arg4[%c4_i32_29] : memref<8x!tpu.dma_semaphore, #tpu.memory_space<semaphore_mem>> -> memref<1x!tpu.dma_semaphore, #tpu.memory_space<semaphore_mem>>
    %49 = tpu.memref_squeeze %48 : memref<1x!tpu.dma_semaphore, #tpu.memory_space<semaphore_mem>> -> memref<!tpu.dma_semaphore, #tpu.memory_space<semaphore_mem>>
    tpu.enqueue_dma source(%46 : memref<1x32xf32, #tpu.memory_space<any>>) target(%47 : memref<1x32xf32, #tpu.memory_space<vmem>>) target_semaphore(%49 : memref<!tpu.dma_semaphore, #tpu.memory_space<semaphore_mem>>)
    %c8_i32_33 = arith.constant 8 : i32
    %50 = arith.muli %arg0, %c8_i32_33 : i32
    %c5_i32 = arith.constant 5 : i32
    %51 = arith.addi %50, %c5_i32 : i32
    %52 = arith.index_cast %51 : i32 to index
    %53 = memref.load %arg1[%52] : memref<16xi32, #tpu.memory_space<smem>>
    %c0_i32_34 = arith.constant 0 : i32
    %54 = arith.maxsi %53, %c0_i32_34 : i32
    %c63_i32_35 = arith.constant 63 : i32
    %55 = arith.minsi %54, %c63_i32_35 : i32
    %c5_i32_36 = arith.constant 5 : i32
    %c0_i32_37 = arith.constant 0 : i32
    %56 = tpu.memref_slice %arg2[%55, %c0_i32_37] : memref<64x32xf32, #tpu.memory_space<any>> -> memref<1x32xf32, #tpu.memory_space<any>>
    %c5_i32_38 = arith.constant 5 : i32
    %c0_i32_39 = arith.constant 0 : i32
    %57 = tpu.memref_slice %arg3[%c5_i32_38, %c0_i32_39] : memref<8x32xf32, #tpu.memory_space<vmem>> -> memref<1x32xf32, #tpu.memory_space<vmem>>
    %58 = tpu.memref_slice %arg4[%c5_i32_36] : memref<8x!tpu.dma_semaphore, #tpu.memory_space<semaphore_mem>> -> memref<1x!tpu.dma_semaphore, #tpu.memory_space<semaphore_mem>>
    %59 = tpu.memref_squeeze %58 : memref<1x!tpu.dma_semaphore, #tpu.memory_space<semaphore_mem>> -> memref<!tpu.dma_semaphore, #tpu.memory_space<semaphore_mem>>
    tpu.enqueue_dma source(%56 : memref<1x32xf32, #tpu.memory_space<any>>) target(%57 : memref<1x32xf32, #tpu.memory_space<vmem>>) target_semaphore(%59 : memref<!tpu.dma_semaphore, #tpu.memory_space<semaphore_mem>>)
    %c8_i32_40 = arith.constant 8 : i32
    %60 = arith.muli %arg0, %c8_i32_40 : i32
    %c6_i32 = arith.constant 6 : i32
    %61 = arith.addi %60, %c6_i32 : i32
    %62 = arith.index_cast %61 : i32 to index
    %63 = memref.load %arg1[%62] : memref<16xi32, #tpu.memory_space<smem>>
    %c0_i32_41 = arith.constant 0 : i32
    %64 = arith.maxsi %63, %c0_i32_41 : i32
    %c63_i32_42 = arith.constant 63 : i32
    %65 = arith.minsi %64, %c63_i32_42 : i32
    %c6_i32_43 = arith.constant 6 : i32
    %c0_i32_44 = arith.constant 0 : i32
    %66 = tpu.memref_slice %arg2[%65, %c0_i32_44] : memref<64x32xf32, #tpu.memory_space<any>> -> memref<1x32xf32, #tpu.memory_space<any>>
    %c6_i32_45 = arith.constant 6 : i32
    %c0_i32_46 = arith.constant 0 : i32
    %67 = tpu.memref_slice %arg3[%c6_i32_45, %c0_i32_46] : memref<8x32xf32, #tpu.memory_space<vmem>> -> memref<1x32xf32, #tpu.memory_space<vmem>>
    %68 = tpu.memref_slice %arg4[%c6_i32_43] : memref<8x!tpu.dma_semaphore, #tpu.memory_space<semaphore_mem>> -> memref<1x!tpu.dma_semaphore, #tpu.memory_space<semaphore_mem>>
    %69 = tpu.memref_squeeze %68 : memref<1x!tpu.dma_semaphore, #tpu.memory_space<semaphore_mem>> -> memref<!tpu.dma_semaphore, #tpu.memory_space<semaphore_mem>>
    tpu.enqueue_dma source(%66 : memref<1x32xf32, #tpu.memory_space<any>>) target(%67 : memref<1x32xf32, #tpu.memory_space<vmem>>) target_semaphore(%69 : memref<!tpu.dma_semaphore, #tpu.memory_space<semaphore_mem>>)
    %c8_i32_47 = arith.constant 8 : i32
    %70 = arith.muli %arg0, %c8_i32_47 : i32
    %c7_i32 = arith.constant 7 : i32
    %71 = arith.addi %70, %c7_i32 : i32
    %72 = arith.index_cast %71 : i32 to index
    %73 = memref.load %arg1[%72] : memref<16xi32, #tpu.memory_space<smem>>
    %c0_i32_48 = arith.constant 0 : i32
    %74 = arith.maxsi %73, %c0_i32_48 : i32
    %c63_i32_49 = arith.constant 63 : i32
    %75 = arith.minsi %74, %c63_i32_49 : i32
    %c7_i32_50 = arith.constant 7 : i32
    %c0_i32_51 = arith.constant 0 : i32
    %76 = tpu.memref_slice %arg2[%75, %c0_i32_51] : memref<64x32xf32, #tpu.memory_space<any>> -> memref<1x32xf32, #tpu.memory_space<any>>
    %c7_i32_52 = arith.constant 7 : i32
    %c0_i32_53 = arith.constant 0 : i32
    %77 = tpu.memref_slice %arg3[%c7_i32_52, %c0_i32_53] : memref<8x32xf32, #tpu.memory_space<vmem>> -> memref<1x32xf32, #tpu.memory_space<vmem>>
    %78 = tpu.memref_slice %arg4[%c7_i32_50] : memref<8x!tpu.dma_semaphore, #tpu.memory_space<semaphore_mem>> -> memref<1x!tpu.dma_semaphore, #tpu.memory_space<semaphore_mem>>
    %79 = tpu.memref_squeeze %78 : memref<1x!tpu.dma_semaphore, #tpu.memory_space<semaphore_mem>> -> memref<!tpu.dma_semaphore, #tpu.memory_space<semaphore_mem>>
    tpu.enqueue_dma source(%76 : memref<1x32xf32, #tpu.memory_space<any>>) target(%77 : memref<1x32xf32, #tpu.memory_space<vmem>>) target_semaphore(%79 : memref<!tpu.dma_semaphore, #tpu.memory_space<semaphore_mem>>)
    %c0_i32_54 = arith.constant 0 : i32
    %c0_i32_55 = arith.constant 0 : i32
    %c0_i32_56 = arith.constant 0 : i32
    %80 = tpu.memref_slice %arg2[%c0_i32_55, %c0_i32_56] : memref<64x32xf32, #tpu.memory_space<any>> -> memref<1x32xf32, #tpu.memory_space<any>>
    %c0_i32_57 = arith.constant 0 : i32
    %c0_i32_58 = arith.constant 0 : i32
    %81 = tpu.memref_slice %arg3[%c0_i32_57, %c0_i32_58] : memref<8x32xf32, #tpu.memory_space<vmem>> -> memref<1x32xf32, #tpu.memory_space<vmem>>
    %82 = tpu.memref_slice %arg4[%c0_i32_54] : memref<8x!tpu.dma_semaphore, #tpu.memory_space<semaphore_mem>> -> memref<1x!tpu.dma_semaphore, #tpu.memory_space<semaphore_mem>>
    %83 = tpu.memref_squeeze %82 : memref<1x!tpu.dma_semaphore, #tpu.memory_space<semaphore_mem>> -> memref<!tpu.dma_semaphore, #tpu.memory_space<semaphore_mem>>
    tpu.wait_dma2 semaphore(%83 : memref<!tpu.dma_semaphore, #tpu.memory_space<semaphore_mem>>) src(%80 : memref<1x32xf32, #tpu.memory_space<any>>) dst(%81 : memref<1x32xf32, #tpu.memory_space<vmem>>)
    %c1_i32_59 = arith.constant 1 : i32
    %c0_i32_60 = arith.constant 0 : i32
    %c0_i32_61 = arith.constant 0 : i32
    %84 = tpu.memref_slice %arg2[%c0_i32_60, %c0_i32_61] : memref<64x32xf32, #tpu.memory_space<any>> -> memref<1x32xf32, #tpu.memory_space<any>>
    %c1_i32_62 = arith.constant 1 : i32
    %c0_i32_63 = arith.constant 0 : i32
    %85 = tpu.memref_slice %arg3[%c1_i32_62, %c0_i32_63] : memref<8x32xf32, #tpu.memory_space<vmem>> -> memref<1x32xf32, #tpu.memory_space<vmem>>
    %86 = tpu.memref_slice %arg4[%c1_i32_59] : memref<8x!tpu.dma_semaphore, #tpu.memory_space<semaphore_mem>> -> memref<1x!tpu.dma_semaphore, #tpu.memory_space<semaphore_mem>>
    %87 = tpu.memref_squeeze %86 : memref<1x!tpu.dma_semaphore, #tpu.memory_space<semaphore_mem>> -> memref<!tpu.dma_semaphore, #tpu.memory_space<semaphore_mem>>
    tpu.wait_dma2 semaphore(%87 : memref<!tpu.dma_semaphore, #tpu.memory_space<semaphore_mem>>) src(%84 : memref<1x32xf32, #tpu.memory_space<any>>) dst(%85 : memref<1x32xf32, #tpu.memory_space<vmem>>)
    %c2_i32_64 = arith.constant 2 : i32
    %c0_i32_65 = arith.constant 0 : i32
    %c0_i32_66 = arith.constant 0 : i32
    %88 = tpu.memref_slice %arg2[%c0_i32_65, %c0_i32_66] : memref<64x32xf32, #tpu.memory_space<any>> -> memref<1x32xf32, #tpu.memory_space<any>>
    %c2_i32_67 = arith.constant 2 : i32
    %c0_i32_68 = arith.constant 0 : i32
    %89 = tpu.memref_slice %arg3[%c2_i32_67, %c0_i32_68] : memref<8x32xf32, #tpu.memory_space<vmem>> -> memref<1x32xf32, #tpu.memory_space<vmem>>
    %90 = tpu.memref_slice %arg4[%c2_i32_64] : memref<8x!tpu.dma_semaphore, #tpu.memory_space<semaphore_mem>> -> memref<1x!tpu.dma_semaphore, #tpu.memory_space<semaphore_mem>>
    %91 = tpu.memref_squeeze %90 : memref<1x!tpu.dma_semaphore, #tpu.memory_space<semaphore_mem>> -> memref<!tpu.dma_semaphore, #tpu.memory_space<semaphore_mem>>
    tpu.wait_dma2 semaphore(%91 : memref<!tpu.dma_semaphore, #tpu.memory_space<semaphore_mem>>) src(%88 : memref<1x32xf32, #tpu.memory_space<any>>) dst(%89 : memref<1x32xf32, #tpu.memory_space<vmem>>)
    %c3_i32_69 = arith.constant 3 : i32
    %c0_i32_70 = arith.constant 0 : i32
    %c0_i32_71 = arith.constant 0 : i32
    %92 = tpu.memref_slice %arg2[%c0_i32_70, %c0_i32_71] : memref<64x32xf32, #tpu.memory_space<any>> -> memref<1x32xf32, #tpu.memory_space<any>>
    %c3_i32_72 = arith.constant 3 : i32
    %c0_i32_73 = arith.constant 0 : i32
    %93 = tpu.memref_slice %arg3[%c3_i32_72, %c0_i32_73] : memref<8x32xf32, #tpu.memory_space<vmem>> -> memref<1x32xf32, #tpu.memory_space<vmem>>
    %94 = tpu.memref_slice %arg4[%c3_i32_69] : memref<8x!tpu.dma_semaphore, #tpu.memory_space<semaphore_mem>> -> memref<1x!tpu.dma_semaphore, #tpu.memory_space<semaphore_mem>>
    %95 = tpu.memref_squeeze %94 : memref<1x!tpu.dma_semaphore, #tpu.memory_space<semaphore_mem>> -> memref<!tpu.dma_semaphore, #tpu.memory_space<semaphore_mem>>
    tpu.wait_dma2 semaphore(%95 : memref<!tpu.dma_semaphore, #tpu.memory_space<semaphore_mem>>) src(%92 : memref<1x32xf32, #tpu.memory_space<any>>) dst(%93 : memref<1x32xf32, #tpu.memory_space<vmem>>)
    %c4_i32_74 = arith.constant 4 : i32
    %c0_i32_75 = arith.constant 0 : i32
    %c0_i32_76 = arith.constant 0 : i32
    %96 = tpu.memref_slice %arg2[%c0_i32_75, %c0_i32_76] : memref<64x32xf32, #tpu.memory_space<any>> -> memref<1x32xf32, #tpu.memory_space<any>>
    %c4_i32_77 = arith.constant 4 : i32
    %c0_i32_78 = arith.constant 0 : i32
    %97 = tpu.memref_slice %arg3[%c4_i32_77, %c0_i32_78] : memref<8x32xf32, #tpu.memory_space<vmem>> -> memref<1x32xf32, #tpu.memory_space<vmem>>
    %98 = tpu.memref_slice %arg4[%c4_i32_74] : memref<8x!tpu.dma_semaphore, #tpu.memory_space<semaphore_mem>> -> memref<1x!tpu.dma_semaphore, #tpu.memory_space<semaphore_mem>>
    %99 = tpu.memref_squeeze %98 : memref<1x!tpu.dma_semaphore, #tpu.memory_space<semaphore_mem>> -> memref<!tpu.dma_semaphore, #tpu.memory_space<semaphore_mem>>
    tpu.wait_dma2 semaphore(%99 : memref<!tpu.dma_semaphore, #tpu.memory_space<semaphore_mem>>) src(%96 : memref<1x32xf32, #tpu.memory_space<any>>) dst(%97 : memref<1x32xf32, #tpu.memory_space<vmem>>)
    %c5_i32_79 = arith.constant 5 : i32
    %c0_i32_80 = arith.constant 0 : i32
    %c0_i32_81 = arith.constant 0 : i32
    %100 = tpu.memref_slice %arg2[%c0_i32_80, %c0_i32_81] : memref<64x32xf32, #tpu.memory_space<any>> -> memref<1x32xf32, #tpu.memory_space<any>>
    %c5_i32_82 = arith.constant 5 : i32
    %c0_i32_83 = arith.constant 0 : i32
    %101 = tpu.memref_slice %arg3[%c5_i32_82, %c0_i32_83] : memref<8x32xf32, #tpu.memory_space<vmem>> -> memref<1x32xf32, #tpu.memory_space<vmem>>
    %102 = tpu.memref_slice %arg4[%c5_i32_79] : memref<8x!tpu.dma_semaphore, #tpu.memory_space<semaphore_mem>> -> memref<1x!tpu.dma_semaphore, #tpu.memory_space<semaphore_mem>>
    %103 = tpu.memref_squeeze %102 : memref<1x!tpu.dma_semaphore, #tpu.memory_space<semaphore_mem>> -> memref<!tpu.dma_semaphore, #tpu.memory_space<semaphore_mem>>
    tpu.wait_dma2 semaphore(%103 : memref<!tpu.dma_semaphore, #tpu.memory_space<semaphore_mem>>) src(%100 : memref<1x32xf32, #tpu.memory_space<any>>) dst(%101 : memref<1x32xf32, #tpu.memory_space<vmem>>)
    %c6_i32_84 = arith.constant 6 : i32
    %c0_i32_85 = arith.constant 0 : i32
    %c0_i32_86 = arith.constant 0 : i32
    %104 = tpu.memref_slice %arg2[%c0_i32_85, %c0_i32_86] : memref<64x32xf32, #tpu.memory_space<any>> -> memref<1x32xf32, #tpu.memory_space<any>>
    %c6_i32_87 = arith.constant 6 : i32
    %c0_i32_88 = arith.constant 0 : i32
    %105 = tpu.memref_slice %arg3[%c6_i32_87, %c0_i32_88] : memref<8x32xf32, #tpu.memory_space<vmem>> -> memref<1x32xf32, #tpu.memory_space<vmem>>
    %106 = tpu.memref_slice %arg4[%c6_i32_84] : memref<8x!tpu.dma_semaphore, #tpu.memory_space<semaphore_mem>> -> memref<1x!tpu.dma_semaphore, #tpu.memory_space<semaphore_mem>>
    %107 = tpu.memref_squeeze %106 : memref<1x!tpu.dma_semaphore, #tpu.memory_space<semaphore_mem>> -> memref<!tpu.dma_semaphore, #tpu.memory_space<semaphore_mem>>
    tpu.wait_dma2 semaphore(%107 : memref<!tpu.dma_semaphore, #tpu.memory_space<semaphore_mem>>) src(%104 : memref<1x32xf32, #tpu.memory_space<any>>) dst(%105 : memref<1x32xf32, #tpu.memory_space<vmem>>)
    %c7_i32_89 = arith.constant 7 : i32
    %c0_i32_90 = arith.constant 0 : i32
    %c0_i32_91 = arith.constant 0 : i32
    %108 = tpu.memref_slice %arg2[%c0_i32_90, %c0_i32_91] : memref<64x32xf32, #tpu.memory_space<any>> -> memref<1x32xf32, #tpu.memory_space<any>>
    %c7_i32_92 = arith.constant 7 : i32
    %c0_i32_93 = arith.constant 0 : i32
    %109 = tpu.memref_slice %arg3[%c7_i32_92, %c0_i32_93] : memref<8x32xf32, #tpu.memory_space<vmem>> -> memref<1x32xf32, #tpu.memory_space<vmem>>
    %110 = tpu.memref_slice %arg4[%c7_i32_89] : memref<8x!tpu.dma_semaphore, #tpu.memory_space<semaphore_mem>> -> memref<1x!tpu.dma_semaphore, #tpu.memory_space<semaphore_mem>>
    %111 = tpu.memref_squeeze %110 : memref<1x!tpu.dma_semaphore, #tpu.memory_space<semaphore_mem>> -> memref<!tpu.dma_semaphore, #tpu.memory_space<semaphore_mem>>
    tpu.wait_dma2 semaphore(%111 : memref<!tpu.dma_semaphore, #tpu.memory_space<semaphore_mem>>) src(%108 : memref<1x32xf32, #tpu.memory_space<any>>) dst(%109 : memref<1x32xf32, #tpu.memory_space<vmem>>)
    return
  }
  func.func @transform_1(%arg0: i32, %arg1: memref<16xi32, #tpu.memory_space<smem>>) -> (i32, i32) {
    %c0_i32 = arith.constant 0 : i32
    %c0_i32_0 = arith.constant 0 : i32
    return %arg0, %c0_i32 : i32, i32
  }
}

</mosaic_0001>

<bundles_post_ra>
// kernel: tpu_custom_call.1
= control target key start
LH: loop header
LB: loop body
LE: loop exit
PB: predicated region body
PF: predicated region fallthrough
CT: control target
= control target key end

     0   :  { %s1057_s0 = inlined_call_operand.vmem [shape: s32[16], index: 0, kind: input, shape index: {}]   ;;  %s1058_s1 = inlined_call_operand.vmem [shape: f32[64,32], index: 1, kind: input, shape index: {}]   ;;  %s1059_s2 = inlined_call_operand.hbm [shape: f32[16,32], index: 2, kind: output, shape index: {}]  }
   0x1   :  { %s7_s11 = sshll.u32 %s1057_s0, 4  ;;  %s8_s11 = int_to_ptr.vmem [resolvable:$true] %s7_s11 }
   0x2   :  { %s835_s12 = scalar_lea.vmem %s8_s11, 16  ;;  %p840_p1 = scmp.lt.s32.totalorder %s8_s11, %s8_s11 }
   0x3   :  { %p836_p0 = scmp.ne.s32.totalorder %s8_s11, %s835_s12  ;;  %p841_p2 = scmp.lt.s32.totalorder %s835_s12, %s835_s12 }
   0x5   :  { %p842_p3 = por %p841_p2, %p840_p1 }
   0x7   :  { %p843_p4 = pnand %p842_p3, %p836_p0 }
   0x9   :  { %846 = shalt.err (!%p843_p4)  }
   0xa   :  { %s919_s13 = smov [#allocation4]  }
   0xb   :  { %10 = dma.vmem_to_smem %s8_s11, 16, %s919_s13, [#allocation3] }
   0xc   :  { %885 = dma.done.wait [#allocation3], 16 }
   0xd   :  { %886 = vsyncadd [#allocation3], 4294967280 }
   0xe   :  { %12 = sfence }
   0xf   :  { %13 = vsyncpa [#allocation6], 0 }
  0x10   :  { %15 = vsyncpa [#allocation6 + $0x1], 0  ;;  %s939_s14 = smov 0   ;;  %s941_s15 = smov 0  }
  0x11   :  { %s943_s0 = smov 0  }
  0x12 LB: > { %s716_s16 = sadd.s32 4294967295, %s917_s0   ;;  %s956_s17 = sadd.s32 1, %s917_s0   ;;  %s917_s0 = sphi %s943_s0, %s1064_s0   ;;  %s913_s15 = sphi %s941_s15, %s1063_s15   ;;  %s909_s14 = sphi %s939_s14, %s1062_s14  }
  0x13   : > { %s24_s18 = ssub.s32 %s917_s0, %s956_s17  ;;  %s27_s19 = sadd.s32 1, %s913_s15 }
  0x14   : > { %p25_p5 = scmp.eq.s32.totalorder %s24_s18, 0  ;;  %p717_p6 = scmp.ne.s32.totalorder %s24_s18, 0 }
  0x15   : > { %p31_p7 = scmp.eq.s32.totalorder %s917_s0, 1  ;;  %p36_p8 = scmp.ne.s32.totalorder %s913_s15, %s909_s14 }
  0x16   : > { %s965_s20 = scalar_select %p25_p5, %s913_s15, %s27_s19  }
  0x17   : > { %p967_p9 = por %p717_p6, %p31_p7  ;;  %p37_p10 = scmp.eq.s32.totalorder %s716_s16, 1 }
  0x18   : > { %p718_p12 = scmp.ge.s32.totalorder %s917_s0, 2 }
  0x19   : > { %p971_p11 = por %p37_p10, %p36_p8  ;;  %s977_s23 = sshll.u32 (!%p718_p12), %s917_s0, 3 }
  0x1a   : > { %46 = sbr.rel (%p718_p12) target bundleno = 176 (0xb0), region = 12  ;;  %s55_s24 = sld [smem:[#allocation4 + %s977_s23]] (!%p718_p12) }
  0x1b   : > { %s51_s25 = sand.u32 (!%p718_p12), 1, %s913_s15  }
  0x1c   : > { %s719_s26 = sshll.u32 (!%p718_p12), %s51_s25, 3 }
  0x1d   : > { %s986_s30 = scalar_lea.vmem (!%p718_p12), [#allocation5], %s719_s26 }
  0x20   : > { %p56_p13 = scmp.gt.s32.totalorder %s55_s24, 0  ;;  %p721_p0 = scmp.lt.s32.totalorder %s55_s24, 63 }
  0x22   : > { %s1066_s24 = smov (!%p56_p13, %s55_s24), 0 }
  0x23   : > { %s1068_s24 = smov (!%p721_p0, %s1066_s24), 63 }
  0x24   : > { %s60_s29 = scalar_lea.vmem %s1058_s1, %s1068_s24 }
  0x25   : > { %v79_v0 = vld [vmem:[%s60_s29] sm:$0x1] }
  0x26   : > { %80 = vst [vmem:[%s986_s30] sm:$0x1] %v79_v0 }
  0x27   : > { %106 = vsyncadd [#allocation2], 16  ;;  %s107_s3 = sadd.s32 1, %s977_s23 }
  0x28   : > { %s108_s4 = sld [smem:[#allocation4 + %s107_s3]] }
  0x2e   : > { %p109_p1 = scmp.gt.s32.totalorder %s108_s4, 0  ;;  %p726_p2 = scmp.lt.s32.totalorder %s108_s4, 63 }
  0x30   : > { %s1070_s4 = smov (!%p109_p1, %s108_s4), 0 }
  0x31   : > { %s1072_s4 = smov (!%p726_p2, %s1070_s4), 63 }
  0x32   : > { %s113_s7 = scalar_lea.vmem %s1058_s1, %s1072_s4 }
  0x33   : > { %v134_v1 = vld [vmem:[%s113_s7] sm:$0x1] }
  0x34   : > { %732 = vst [vmem:[%s986_s30 + $0x1] sm:$0x1] %v134_v1 }
  0x35   : > { %161 = vsyncadd [#allocation2 + $0x1], 16  ;;  %s162_s8 = sadd.s32 2, %s977_s23 }
  0x36   : > { %s163_s9 = sld [smem:[#allocation4 + %s162_s8]] }
  0x3c   : > { %p164_p3 = scmp.gt.s32.totalorder %s163_s9, 0  ;;  %p733_p4 = scmp.lt.s32.totalorder %s163_s9, 63 }
  0x3e   : > { %s1074_s9 = smov (!%p164_p3, %s163_s9), 0 }
  0x3f   : > { %s1076_s9 = smov (!%p733_p4, %s1074_s9), 63 }
  0x40   : > { %s168_s12 = scalar_lea.vmem %s1058_s1, %s1076_s9 }
  0x41   : > { %v189_v2 = vld [vmem:[%s168_s12] sm:$0x1] }
  0x42   : > { %739 = vst [vmem:[%s986_s30 + $0x2] sm:$0x1] %v189_v2 }
  0x43   : > { %216 = vsyncadd [#allocation2 + $0x2], 16  ;;  %s217_s13 = sadd.s32 3, %s977_s23 }
  0x44   : > { %s218_s16 = sld [smem:[#allocation4 + %s217_s13]] }
  0x4a   : > { %p219_p5 = scmp.gt.s32.totalorder %s218_s16, 0  ;;  %p740_p6 = scmp.lt.s32.totalorder %s218_s16, 63 }
  0x4c   : > { %s1078_s16 = smov (!%p219_p5, %s218_s16), 0 }
  0x4d   : > { %s1080_s16 = smov (!%p740_p6, %s1078_s16), 63 }
  0x4e   : > { %s223_s24 = scalar_lea.vmem %s1058_s1, %s1080_s16 }
  0x4f   : > { %v244_v3 = vld [vmem:[%s223_s24] sm:$0x1] }
  0x50   : > { %746 = vst [vmem:[%s986_s30 + $0x3] sm:$0x1] %v244_v3 }
  0x51   : > { %271 = vsyncadd [#allocation2 + $0x3], 16  ;;  %s272_s26 = sadd.s32 4, %s977_s23 }
  0x52   : > { %s273_s27 = sld [smem:[#allocation4 + %s272_s26]] }
  0x58   : > { %p274_p7 = scmp.gt.s32.totalorder %s273_s27, 0  ;;  %p747_p8 = scmp.lt.s32.totalorder %s273_s27, 63 }
  0x5a   : > { %s1082_s27 = smov (!%p274_p7, %s273_s27), 0 }
  0x5b   : > { %s1084_s27 = smov (!%p747_p8, %s1082_s27), 63 }
  0x5c   : > { %s278_s3 = scalar_lea.vmem %s1058_s1, %s1084_s27 }
  0x5d   : > { %v299_v4 = vld [vmem:[%s278_s3] sm:$0x1] }
  0x5e   : > { %753 = vst [vmem:[%s986_s30 + $0x4] sm:$0x1] %v299_v4 }
  0x5f   : > { %326 = vsyncadd [#allocation2 + $0x4], 16  ;;  %s327_s4 = sadd.s32 5, %s977_s23 }
  0x60   : > { %s328_s5 = sld [smem:[#allocation4 + %s327_s4]] }
  0x66   : > { %p329_p10 = scmp.gt.s32.totalorder %s328_s5, 0  ;;  %p754_p12 = scmp.lt.s32.totalorder %s328_s5, 63 }
  0x68   : > { %s1086_s5 = smov (!%p329_p10, %s328_s5), 0 }
  0x69   : > { %s1088_s5 = smov (!%p754_p12, %s1086_s5), 63 }
  0x6a   : > { %s333_s8 = scalar_lea.vmem %s1058_s1, %s1088_s5 }
  0x6b   : > { %v354_v5 = vld [vmem:[%s333_s8] sm:$0x1] }
  0x6c   : > { %760 = vst [vmem:[%s986_s30 + $0x5] sm:$0x1] %v354_v5 }
  0x6d   : > { %381 = vsyncadd [#allocation2 + $0x5], 16  ;;  %s382_s9 = sadd.s32 6, %s977_s23 }
  0x6e   : > { %s383_s10 = sld [smem:[#allocation4 + %s382_s9]] }
  0x74   : > { %p384_p13 = scmp.gt.s32.totalorder %s383_s10, 0  ;;  %p761_p0 = scmp.lt.s32.totalorder %s383_s10, 63 }
  0x76   : > { %s1090_s10 = smov (!%p384_p13, %s383_s10), 0 }
  0x77   : > { %s1092_s10 = smov (!%p761_p0, %s1090_s10), 63 }
  0x78   : > { %s388_s13 = scalar_lea.vmem %s1058_s1, %s1092_s10 }
  0x79   : > { %v409_v6 = vld [vmem:[%s388_s13] sm:$0x1] }
  0x7a   : > { %767 = vst [vmem:[%s986_s30 + $0x6] sm:$0x1] %v409_v6 }
  0x7b   : > { %436 = vsyncadd [#allocation2 + $0x6], 16  ;;  %s437_s16 = sadd.s32 7, %s977_s23 }
  0x7c   : > { %s438_s18 = sld [smem:[#allocation4 + %s437_s16]] }
  0x82   : > { %p439_p1 = scmp.gt.s32.totalorder %s438_s18, 0  ;;  %p768_p2 = scmp.lt.s32.totalorder %s438_s18, 63 }
  0x84   : > { %s1094_s18 = smov (!%p439_p1, %s438_s18), 0 }
  0x85   : > { %s1096_s18 = smov (!%p768_p2, %s1094_s18), 63 }
  0x86   : > { %s443_s26 = scalar_lea.vmem %s1058_s1, %s1096_s18 }
  0x87   : > { %v464_v7 = vld [vmem:[%s443_s26] sm:$0x1] }
  0x88   : > { %774 = vst [vmem:[%s986_s30 + $0x7] sm:$0x1] %v464_v7 }
  0x89   : > { %491 = vsyncadd [#allocation2 + $0x7], 16 }
  0x8a   : > { %887 = dma.done.wait [#allocation2], 16 }
  0x8b   : > { %888 = vsyncadd [#allocation2], 4294967280 }
  0x8c   : > { %889 = dma.done.wait [#allocation2 + $0x1], 16 }
  0x8d   : > { %890 = vsyncadd [#allocation2 + $0x1], 4294967280 }
  0x8e   : > { %891 = dma.done.wait [#allocation2 + $0x2], 16 }
  0x8f   : > { %892 = vsyncadd [#allocation2 + $0x2], 4294967280 }
  0x90   : > { %893 = dma.done.wait [#allocation2 + $0x3], 16 }
  0x91   : > { %894 = vsyncadd [#allocation2 + $0x3], 4294967280 }
  0x92   : > { %895 = dma.done.wait [#allocation2 + $0x4], 16 }
  0x93   : > { %896 = vsyncadd [#allocation2 + $0x4], 4294967280 }
  0x94   : > { %897 = dma.done.wait [#allocation2 + $0x5], 16 }
  0x95   : > { %898 = vsyncadd [#allocation2 + $0x5], 4294967280 }
  0x96   : > { %899 = dma.done.wait [#allocation2 + $0x6], 16 }
  0x97   : > { %900 = vsyncadd [#allocation2 + $0x6], 4294967280 }
  0x98   : > { %901 = dma.done.wait [#allocation2 + $0x7], 16 }
  0x99   : > { %902 = vsyncadd [#allocation2 + $0x7], 4294967280  ;;  %s776_s23 = sshll.u32 %s917_s0, 7  ;;  %s523_s3 = sshll.u32 %s986_s30, 4  ;;  %s524_s3 = int_to_ptr.vmem [resolvable:$true] %s523_s3 }
  0x9a   : > { %s521_s29 = scalar_lea.hbm %s1059_s2, %s776_s23  ;;  %s510_s4 = scalar_lea.sflag [#allocation6], %s51_s25 }
  0x9b   : > { %s847_s5 = scalar_lea.vmem %s524_s3, 128  ;;  %s920_s6 = smov [#allocation5]  }
  0x9c   : > { %p848_p3 = scmp.ne.s32.totalorder %s524_s3, %s847_s5  ;;  %s851_s7 = sshll.u32 %s920_s6, 4  ;;  %s852_s7 = int_to_ptr.vmem [resolvable:$false] %s851_s7 }
  0x9d   : > { %s853_s8 = scalar_lea.vmem %s852_s7, 256  ;;  %p854_p6 = scmp.lt.s32.totalorder %s524_s3, %s852_s7 }
  0x9e   : > { %p849_p4 = pnand %p848_p3, %p967_p9  ;;  %p855_p7 = scmp.lt.s32.totalorder %s853_s8, %s847_s5 }
  0xa0   : > { %p850_p5 = pneg %p849_p4  ;;  %p856_p8 = por %p855_p7, %p854_p6 }
  0xa2   : > { %p857_p10 = pnand %p856_p8, %p850_p5 }
  0xa4   : > { %860 = shalt.err (!%p857_p10)
}
  0xa5   : > { %s861_s9 = scalar_lea.hbm %s521_s29, 128  ;;  %s865_s10 = scalar_lea.hbm %s1059_s2, 256 }
  0xa6   : > { %p862_p12 = scmp.ne.s32.totalorder %s521_s29, %s861_s9  ;;  %p866_p1 = scmp.lt.s32.totalorder %s521_s29, %s1059_s2 }
  0xa7   : > { %p867_p2 = scmp.lt.s32.totalorder %s865_s10, %s861_s9 }
  0xa8   : > { %p863_p13 = pnand %p862_p12, %p967_p9 }
  0xa9   : > { %p868_p3 = por %p867_p2, %p866_p1 }
  0xaa   : > { %p864_p0 = pneg %p863_p13 }
  0xac   : > { %p869_p4 = pnand %p868_p3, %p864_p0 }
  0xae   : > { %872 = shalt.err (!%p869_p4)
}
  0xaf   : > { %803 = dma.vmem_to_hbm [thread:$0]  (%p967_p9), %s524_s3, 128, %s521_s29, %s510_s4  }
  0xb0 PF: > { %p809_p5 = scmp.ge.s32.totalorder %s917_s0, 1  ;;  %s535_s13 = sand.u32 1, %s909_s14  }
  0xb1   : > { %s536_s16 = scalar_lea.sflag [#allocation6], %s535_s13 }
  0xb2   : > { %p806_p6 = pnand %p809_p5, %p971_p11 }
  0xb4   : > { %p807_p7 = pneg %p806_p6 }
  0xb6   : > { %904 = dma.done.wait (%p807_p7), %s536_s16, 128  }
  0xb7   : > { %906 = vsyncadd (%p807_p7), %s536_s16, 4294967168  ;;  %p18_p8 = scmp.ge.s32.totalorder %s956_s17, 3   ;;  %s1062_s14 = smov %s913_s15 }
  0xb8   : > { %s1063_s15 = smov %s965_s20  ;;  %s1064_s0 = smov %s956_s17 }
  0xb9   :  { %20 = sbr.rel (!%p18_p8) target bundleno = 18 (0x12), region = 393 }
  0xbe   :  { %541 = vsyncpa [#allocation6], 1 }
  0xbf   :  { %543 = vsyncpa [#allocation6 + $0x1], 1 }
  0xc0   :  { %544 = vsyncmov [#allocation2] }
  0xc3   :  { %s545_s0 = vpop.sfrf %544 }
  0xc4   :  { %p779_p9 = scmp.ne.s32.totalorder %s545_s0, 0 }
  0xc6   :  { %549 = shalt.err (%p779_p9)  }
  0xc7   :  { %551 = vsyncmov [#allocation2 + $0x1] }
  0xca   :  { %s552_s21 = vpop.sfrf %551 }
  0xcb   :  { %p780_p11 = scmp.ne.s32.totalorder %s552_s21, 0 }
  0xcd   :  { %556 = shalt.err (%p780_p11)  }
  0xce   :  { %558 = vsyncmov [#allocation2 + $0x2] }
  0xd1   :  { %s559_s22 = vpop.sfrf %558 }
  0xd2   :  { %p781_p10 = scmp.ne.s32.totalorder %s559_s22, 0 }
  0xd4   :  { %563 = shalt.err (%p781_p10)  }
  0xd5   :  { %565 = vsyncmov [#allocation2 + $0x3] }
  0xd8   :  { %s566_s18 = vpop.sfrf %565 }
  0xd9   :  { %p782_p12 = scmp.ne.s32.totalorder %s566_s18, 0 }
  0xdb   :  { %570 = shalt.err (%p782_p12)  }
  0xdc   :  { %572 = vsyncmov [#allocation2 + $0x4] }
  0xdf   :  { %s573_s17 = vpop.sfrf %572 }
  0xe0   :  { %p783_p13 = scmp.ne.s32.totalorder %s573_s17, 0 }
  0xe2   :  { %577 = shalt.err (%p783_p13)  }
  0xe3   :  { %579 = vsyncmov [#allocation2 + $0x5] }
  0xe6   :  { %s580_s1 = vpop.sfrf %579 }
  0xe7   :  { %p784_p0 = scmp.ne.s32.totalorder %s580_s1, 0 }
  0xe9   :  { %584 = shalt.err (%p784_p0)  }
  0xea   :  { %586 = vsyncmov [#allocation2 + $0x6] }
  0xed   :  { %s587_s2 = vpop.sfrf %586 }
  0xee   :  { %p785_p1 = scmp.ne.s32.totalorder %s587_s2, 0 }
  0xf0   :  { %591 = shalt.err (%p785_p1)  }
  0xf1   :  { %593 = vsyncmov [#allocation2 + $0x7] }
  0xf4   :  { %s594_s14 = vpop.sfrf %593 }
  0xf5   :  { %p786_p2 = scmp.ne.s32.totalorder %s594_s14, 0 }
  0xf7   :  { %598 = shalt.err (%p786_p2)  }

</bundles_post_ra>
